<compile_context>
chip_gen: v5e
topology: v5e:2x2
jax: 0.10.0
libtpu: 0.0.40
codegen_flags: <defaults>
</compile_context>

<pallas_src>
import jax
import jax.numpy as jnp
from jax.experimental import pallas as pl
from jax.experimental.pallas import tpu as pltpu


def _round_up(x, m):
    return ((x + m - 1) // m) * m


def spoc_forward(feats, batch_ids, num_batches, *, tile_n=1024, tile_c=None):
    """Global average pooling over points grouped by batch id.

    feats:      [N, C] float (f32 / bf16 fed straight to the MXU, no cast)
    batch_ids:  [N]    int32 in [0, num_batches)
    returns:    [num_batches, C] per-batch mean features
    """
    N, C = feats.shape

    # --- channel blocking: lane-dense blocks (multiple of 128) when possible.
    if tile_c is None:
        tile_c = min(C, 512) if C % 128 == 0 else C
    if C % tile_c != 0 or (tile_c % 128 != 0 and tile_c != C):
        tile_c = C

    # --- point blocking: big tiles (amortize ~0.35us/step, deep MXU K), but
    # never larger than needed; keep sublane-aligned (multiple of 8).
    tile_n = min(tile_n, _round_up(N, 8))
    tile_n = max(8, (tile_n // 8) * 8)

    grid_c = C // tile_c
    grid_n = pl.cdiv(N, tile_n)
    has_tail = (N % tile_n) != 0

    bids2d = batch_ids.reshape(1, N).astype(jnp.int32)

    def kernel(bids_ref, feats_ref, out_ref, acc_sum, acc_cnt):
        n = pl.program_id(1)

        @pl.when(n == 0)
        def _():
            acc_sum[...] = jnp.zeros_like(acc_sum)
            acc_cnt[...] = jnp.zeros_like(acc_cnt)

        feats_t = feats_ref[...]            # [tN, tC] native dtype (no f32 cast)
        bids = bids_ref[...]                # [1, tN] int32
        tN = feats_t.shape[0]
        B = acc_sum.shape[0]

        # one_hot[b, p] = 1 if point p belongs to batch b  (built directly as
        # [B, tN] so the MXU contracts over tN without any transpose).
        batch_iota = jax.lax.broadcasted_iota(jnp.int32, (B, tN), 0)
        match = bids == batch_iota          # [B, tN] bool

        if has_tail:
            # Mask points past N on the ragged last tile (stale/garbage block
            # padding must not contribute to sums, counts, or produce NaNs).
            valid_cols = (jax.lax.broadcasted_iota(jnp.int32, (1, tN), 1)
                          + n * tile_n) < N                       # [1, tN]
            match = jnp.logical_and(match, valid_cols)
            valid_rows = (jax.lax.broadcasted_iota(jnp.int32, (tN, 1), 0)
                          + n * tile_n) < N                       # [tN, 1]
            feats_t = jnp.where(valid_rows, feats_t, jnp.zeros_like(feats_t))

        one_hot = match.astype(feats_t.dtype)                     # [B, tN]
        acc_sum[...] += jnp.dot(one_hot, feats_t,
                                preferred_element_type=jnp.float32)   # [B, tC]
        # Exact integer count via boolean row-sum (no second MXU matmul).
        acc_cnt[...] += jnp.sum(match, axis=1,
                                keepdims=True).astype(jnp.float32)    # [B, 1]

        @pl.when(n == pl.num_programs(1) - 1)
        def _():
            cnt = jnp.maximum(acc_cnt[...], 1.0)    # guard empty batches
            out_ref[...] = (acc_sum[...] / cnt).astype(out_ref.dtype)

    return pl.pallas_call(
        kernel,
        out_shape=jax.ShapeDtypeStruct((num_batches, C), feats.dtype),
        grid_spec=pltpu.PrefetchScalarGridSpec(
            num_scalar_prefetch=0,
            grid=(grid_c, grid_n),
            in_specs=[
                pl.BlockSpec((1, tile_n), lambda c, n: (0, n)),       # batch ids
                pl.BlockSpec((tile_n, tile_c), lambda c, n: (n, c)),  # features
            ],
            out_specs=pl.BlockSpec((num_batches, tile_c), lambda c, n: (0, c)),
            scratch_shapes=[
                pltpu.VMEM((num_batches, tile_c), jnp.float32),  # running sums
                pltpu.VMEM((num_batches, 1), jnp.float32),       # running counts
            ],
        ),
        compiler_params=pltpu.CompilerParams(
            # C-blocks are independent (shardable across v7x's 2 TCs);
            # the point axis is the sequential reduction.
            dimension_semantics=("parallel", "arbitrary"),
        ),
    )(bids2d, feats)


if __name__ == "__main__":
    key = jax.random.PRNGKey(0)
    k_feat, k_bid = jax.random.split(key)

    # Small but representative: 1000 sparse points (ragged vs tile_n=512),
    # 256 channels (2 lane-dense channel blocks), batch of 2.
    N, C, B = 1000, 256, 2
    feats = jax.random.normal(k_feat, (N, C), dtype=jnp.float32)
    batch_ids = jax.random.randint(k_bid, (N,), 0, B, dtype=jnp.int32)

    out = spoc_forward(feats, batch_ids, B, tile_n=512, tile_c=128)
    out = jax.block_until_ready(out)

    # reference: per-batch mean of features (MinkowskiGlobalAvgPooling semantics)
    one_hot = (batch_ids[:, None] == jnp.arange(B)[None, :]).astype(jnp.float32)
    ref_sum = one_hot.T @ feats
    ref_cnt = jnp.maximum(one_hot.sum(0)[:, None], 1.0)
    ref = ref_sum / ref_cnt

    assert out.shape == (B, C)
    assert jnp.allclose(out, ref, atol=1e-4, rtol=1e-4)
    print("KERNEL_OK")
</pallas_src>

<mosaic_0001>
module attributes {stable_mosaic.version = 11 : i64} {
  func.func @kernel(%arg0: i32, %arg1: i32, %arg2: memref<1x512xi32, #tpu.memory_space<vmem>>, %arg3: memref<512x128xf32, #tpu.memory_space<vmem>>, %arg4: memref<2x128xf32, #tpu.memory_space<vmem>>, %arg5: memref<2x128xf32, #tpu.memory_space<vmem>>, %arg6: memref<2x1xf32, #tpu.memory_space<vmem>>) attributes {dimension_semantics = [#tpu.dimension_semantics<parallel>, #tpu.dimension_semantics<arbitrary>], iteration_bounds = array<i64: 2, 2>, scalar_prefetch = 0 : i64, scratch_operands = 2 : i64, tpu.core_type = #tpu.core_type<tc>, window_params = [{transform_indices = @transform_0, window_bounds = array<i64: 1, 512>}, {transform_indices = @transform_1, window_bounds = array<i64: 512, 128>}, {transform_indices = @transform_2, window_bounds = array<i64: 2, 128>}]} {
    %c0_i32 = arith.constant 0 : i32
    %0 = arith.cmpi eq, %arg1, %c0_i32 : i32
    %1 = arith.extui %0 : i1 to i32
    %c0_i32_0 = arith.constant 0 : i32
    %2 = arith.cmpi ne, %1, %c0_i32_0 : i32
    scf.if %2 {
      %cst_17 = arith.constant 0.000000e+00 : f32
      %42 = vector.broadcast %cst_17 : f32 to vector<2x128xf32>
      %c0_18 = arith.constant 0 : index
      %c0_19 = arith.constant 0 : index
      %43 = vector.load %arg5[%c0_18, %c0_19] : memref<2x128xf32, #tpu.memory_space<vmem>>, vector<2x128xf32>
      tpu.vector_store %arg5[%c0_18, %c0_19], %42 {strides = array<i32>} : memref<2x128xf32, #tpu.memory_space<vmem>>, vector<2x128xf32>,
      %cst_20 = arith.constant 0.000000e+00 : f32
      %44 = vector.broadcast %cst_20 : f32 to vector<2x1xf32>
      %c0_21 = arith.constant 0 : index
      %c0_22 = arith.constant 0 : index
      %45 = vector.load %arg6[%c0_21, %c0_22] : memref<2x1xf32, #tpu.memory_space<vmem>>, vector<2x1xf32>
      tpu.vector_store %arg6[%c0_21, %c0_22], %44 {strides = array<i32>} : memref<2x1xf32, #tpu.memory_space<vmem>>, vector<2x1xf32>,
    } else {
    }
    %c0 = arith.constant 0 : index
    %c0_1 = arith.constant 0 : index
    %3 = vector.load %arg3[%c0, %c0_1] : memref<512x128xf32, #tpu.memory_space<vmem>>, vector<512x128xf32>
    %c0_2 = arith.constant 0 : index
    %c0_3 = arith.constant 0 : index
    %4 = vector.load %arg2[%c0_2, %c0_3] : memref<1x512xi32, #tpu.memory_space<vmem>>, vector<1x512xi32>
    %5 = tpu.iota {dimensions = array<i32: 0>} : vector<2x512xi32>
    %6 = vector.broadcast %4 : vector<1x512xi32> to vector<2x512xi32>
    %7 = arith.cmpi eq, %6, %5 : vector<2x512xi32>
    %8 = tpu.iota {dimensions = array<i32: 1>} : vector<1x512xi32>
    %c512_i32 = arith.constant 512 : i32
    %9 = arith.muli %arg1, %c512_i32 : i32
    %10 = vector.broadcast %9 : i32 to vector<1x512xi32>
    %11 = arith.addi %8, %10 : vector<1x512xi32>
    %c1000_i32 = arith.constant 1000 : i32
    %12 = vector.broadcast %c1000_i32 : i32 to vector<1x512xi32>
    %13 = arith.cmpi slt, %11, %12 : vector<1x512xi32>
    %14 = vector.broadcast %13 : vector<1x512xi1> to vector<2x512xi1>
    %15 = arith.andi %7, %14 : vector<2x512xi1>
    %16 = tpu.iota {dimensions = array<i32: 0>} : vector<512x1xi32>
    %c512_i32_4 = arith.constant 512 : i32
    %17 = arith.muli %arg1, %c512_i32_4 : i32
    %18 = vector.broadcast %17 : i32 to vector<512x1xi32>
    %19 = arith.addi %16, %18 : vector<512x1xi32>
    %c1000_i32_5 = arith.constant 1000 : i32
    %20 = vector.broadcast %c1000_i32_5 : i32 to vector<512x1xi32>
    %21 = arith.cmpi slt, %19, %20 : vector<512x1xi32>
    %cst = arith.constant 0.000000e+00 : f32
    %22 = vector.broadcast %cst : f32 to vector<512x128xf32>
    %23 = vector.shape_cast %21 : vector<512x1xi1> to vector<512x1xi1>
    %24 = vector.broadcast %23 : vector<512x1xi1> to vector<512x128xi1>
    %25 = arith.select %24, %3, %22 : vector<512x128xi1>, vector<512x128xf32>
    %26 = arith.extui %15 : vector<2x512xi1> to vector<2x512xi32>
    %27 = arith.sitofp %26 : vector<2x512xi32> to vector<2x512xf32>
    %c0_6 = arith.constant 0 : index
    %c0_7 = arith.constant 0 : index
    %28 = vector.load %arg5[%c0_6, %c0_7] : memref<2x128xf32, #tpu.memory_space<vmem>>, vector<2x128xf32>
    %cst_8 = arith.constant dense<0.000000e+00> : vector<2x128xf32>
    %29 = tpu.matmul %27, %25, %cst_8 {dimension_numbers = #tpu.dot_dimension_numbers<[1], [0], [0], [1], [0, 0, 1, 1], [], []>} : vector<2x512xf32>, vector<512x128xf32>, vector<2x128xf32> -> vector<2x128xf32>
    %30 = arith.addf %28, %29 : vector<2x128xf32>
    %c0_9 = arith.constant 0 : index
    %c0_10 = arith.constant 0 : index
    %31 = vector.load %arg5[%c0_9, %c0_10] : memref<2x128xf32, #tpu.memory_space<vmem>>, vector<2x128xf32>
    tpu.vector_store %arg5[%c0_9, %c0_10], %30 {strides = array<i32>} : memref<2x128xf32, #tpu.memory_space<vmem>>, vector<2x128xf32>,
    %c0_11 = arith.constant 0 : index
    %c0_12 = arith.constant 0 : index
    %32 = vector.load %arg6[%c0_11, %c0_12] : memref<2x1xf32, #tpu.memory_space<vmem>>, vector<2x1xf32>
    %33 = arith.extui %15 : vector<2x512xi1> to vector<2x512xi32>
    %cst_13 = arith.constant dense<0> : vector<2xi32>
    %34 = vector.multi_reduction <add>, %33, %cst_13 [1] : vector<2x512xi32> to vector<2xi32>
    %35 = vector.shape_cast %34 : vector<2xi32> to vector<2x1xi32>
    %36 = arith.sitofp %35 : vector<2x1xi32> to vector<2x1xf32>
    %37 = arith.addf %32, %36 : vector<2x1xf32>
    %c0_14 = arith.constant 0 : index
    %c0_15 = arith.constant 0 : index
    %38 = vector.load %arg6[%c0_14, %c0_15] : memref<2x1xf32, #tpu.memory_space<vmem>>, vector<2x1xf32>
    tpu.vector_store %arg6[%c0_14, %c0_15], %37 {strides = array<i32>} : memref<2x1xf32, #tpu.memory_space<vmem>>, vector<2x1xf32>,
    %c1_i32 = arith.constant 1 : i32
    %39 = arith.cmpi eq, %arg1, %c1_i32 : i32
    %40 = arith.extui %39 : i1 to i32
    %c0_i32_16 = arith.constant 0 : i32
    %41 = arith.cmpi ne, %40, %c0_i32_16 : i32
    scf.if %41 {
      %c0_17 = arith.constant 0 : index
      %c0_18 = arith.constant 0 : index
      %42 = vector.load %arg6[%c0_17, %c0_18] : memref<2x1xf32, #tpu.memory_space<vmem>>, vector<2x1xf32>
      %cst_19 = arith.constant 1.000000e+00 : f32
      %43 = vector.broadcast %cst_19 : f32 to vector<2x1xf32>
      %44 = arith.maximumf %42, %43 : vector<2x1xf32>
      %c0_20 = arith.constant 0 : index
      %c0_21 = arith.constant 0 : index
      %45 = vector.load %arg5[%c0_20, %c0_21] : memref<2x128xf32, #tpu.memory_space<vmem>>, vector<2x128xf32>
      %46 = vector.broadcast %44 : vector<2x1xf32> to vector<2x128xf32>
      %47 = arith.divf %45, %46 : vector<2x128xf32>
      %c0_22 = arith.constant 0 : index
      %c0_23 = arith.constant 0 : index
      %48 = vector.load %arg4[%c0_22, %c0_23] : memref<2x128xf32, #tpu.memory_space<vmem>>, vector<2x128xf32>
      tpu.vector_store %arg4[%c0_22, %c0_23], %47 {strides = array<i32>} : memref<2x128xf32, #tpu.memory_space<vmem>>, vector<2x128xf32>,
    } else {
    }
    return
  }
  func.func @transform_0(%arg0: i32, %arg1: i32) -> (i32, i32) {
    %c0_i32 = arith.constant 0 : i32
    %c0_i32_0 = arith.constant 0 : i32
    return %c0_i32, %arg1 : i32, i32
  }
  func.func @transform_1(%arg0: i32, %arg1: i32) -> (i32, i32) {
    %c0_i32 = arith.constant 0 : i32
    return %arg1, %arg0 : i32, i32
  }
  func.func @transform_2(%arg0: i32, %arg1: i32) -> (i32, i32) {
    %c0_i32 = arith.constant 0 : i32
    %c0_i32_0 = arith.constant 0 : i32
    return %c0_i32, %arg0 : i32, i32
  }
}

</mosaic_0001>

<bundles_post_ra>
// kernel: tpu_custom_call.1
= control target key start
LH: loop header
LB: loop body
LE: loop exit
PB: predicated region body
PF: predicated region fallthrough
CT: control target
= control target key end

     0   :  { %s1995_s0 = inlined_call_operand.hbm [shape: s32[1,1000], index: 0, kind: input, shape index: {}]   ;;  %s1996_s1 = inlined_call_operand.hbm [shape: f32[1000,256], index: 1, kind: input, shape index: {}]   ;;  %s1997_s2 = inlined_call_operand.hbm [shape: f32[2,256], index: 2, kind: output, shape index: {}]  }
   0x1   :  { %2004 = sst [smem:[#allocation22_spill]] %s1995_s0 }
   0x2   :  { %7 = vsyncpa [#allocation5], 0 }
   0x3   :  { %9 = vsyncpa [#allocation5 + $0x1], 0 }
   0x4   :  { %10 = vsyncpa [#allocation8], 0 }
   0x5   :  { %12 = vsyncpa [#allocation8 + $0x1], 0 }
   0x6   :  { %13 = vsyncpa [#allocation6], 0 }
   0x7   :  { %15 = vsyncpa [#allocation6 + $0x1], 0  ;;  %s1462_s9 = smov 0   ;;  %s1464_s10 = smov 0  }
   0x8   :  { %s1466_s11 = smov 0   ;;  %s1468_s12 = smov 0  }
   0x9   :  { %s1470_s13 = smov 0   ;;  %s1472_s14 = smov 0  }
   0xa   :  { %s1474_s15 = smov 0   ;;  %s1476_s16 = smov 0  }
   0xb   :  { %s1478_s17 = smov 0   ;;  %s1480_s18 = smov 0  }
   0xc   :  { %s1482_s19 = smov 0   ;;  %s1484_s20 = smov 0  }
   0xd   :  { %s1486_s21 = smov 0   ;;  %s1488_s22 = smov 0  }
   0xe LB: > { %2005 = sst [smem:[#allocation13_spill]] %s1385_s9  ;;  %s990_s23 = sadd.s32 4294967295, %s1437_s22   ;;  %s1437_s22 = sphi %s1488_s22, %s21_s22   ;;  %s1433_s21 = sphi %s1486_s21, %s2056_s21   ;;  %s1429_s20 = sphi %s1484_s20, %s2055_s20   ;;  %s1425_s19 = sphi %s1482_s19, %s2054_s19   ;;  %s1421_s18 = sphi %s1480_s18, %s2053_s18   ;;  %s1417_s17 = sphi %s1478_s17, %s2043_s17   ;;  %s1413_s16 = sphi %s1476_s16, %s2052_s16   ;;  %s1409_s15 = sphi %s1474_s15, %s2051_s15   ;;  %s1405_s14 = sphi %s1472_s14, %s2050_s14   ;;  %s1401_s13 = sphi %s1470_s13, %s2049_s13   ;;  %s1397_s12 = sphi %s1468_s12, %s2048_s12   ;;  %s1393_s11 = sphi %s1466_s11, %s2040_s11   ;;  %s1389_s10 = sphi %s1464_s10, %s2047_s10   ;;  %s1385_s9 = sphi %s1462_s9, %s2046_s9  }
   0xf   : > { %2006 = sst [smem:[#allocation14_spill]] %s1393_s11  ;;  %s30_s25 = sadd.s32 1, %s1429_s20 }
  0x10   : > { %2007 = sst [smem:[#allocation15_spill]] %s1417_s17  ;;  %s33_s26 = sadd.s32 1, %s1433_s21 }
  0x11   : > { %p31_p0 = scmp.ge.s32.totalorder %s30_s25, 2  ;;  %s40_s27 = sadd.s32 1, %s1417_s17 }
  0x12   : > { %p47_p1 = scmp.ne.s32.totalorder %s1417_s17, %s1413_s16  ;;  %p48_p2 = scmp.eq.s32.totalorder %s1437_s22, 0 }
  0x13   : > { %s2058_s25 = smov (%p31_p0, %s30_s25), 0  ;;  %s2060_s26 = smov (!%p31_p0, %s33_s26), %s1433_s21 }
  0x14   : > { %2008 = sst [smem:[#allocation16_spill]] %s2058_s25  ;;  %s37_s28 = ssub.s32 %s1429_s20, %s2058_s25 }
  0x15   : > { %p1545_p3 = por %p48_p2, %p47_p1  ;;  %p35_p4 = scmp.ge.s32.totalorder %s2060_s26, 2 }
  0x16   : > { %p38_p5 = scmp.eq.s32.totalorder %s37_s28, 0  ;;  %p53_p6 = scmp.ne.s32.totalorder %s1413_s16, %s1409_s15 }
  0x17   : > { %p1552_p7 = scmp.eq.s32.totalorder %s990_s23, 0  ;;  %s2062_s26 = smov (%p35_p4, %s2060_s26), 0 }
  0x18   : > { %2011 = sst [smem:[#allocation17_spill]] %s2062_s26  ;;  %s64_s5 = ssub.s32 %s1433_s21, %s2062_s26 }
  0x19   : > { %s1559_s3 = scalar_select %p38_p5, %s1417_s17, %s40_s27  }
  0x1a   : > { %p1563_p8 = por %p1552_p7, %p53_p6  ;;  %s65_s6 = sor.u32 %s64_s5, %s37_s28 }
  0x1b   : > { %2012 = sst [smem:[#allocation18_spill]] %s1559_s3  ;;  %s68_s7 = sadd.s32 1, %s1405_s14 }
  0x1c   : > { %p66_p9 = scmp.eq.s32.totalorder %s65_s6, 0  ;;  %p75_p10 = scmp.ne.s32.totalorder %s1405_s14, %s1401_s13 }
  0x1d   : > { %p81_p11 = scmp.ne.s32.totalorder %s1401_s13, %s1397_s12  ;;  %p92_p12 = scmp.eq.s32.totalorder %s64_s5, 0 }
  0x1e   : > { %s1575_s8 = scalar_select %p66_p9, %s1405_s14, %s68_s7  }
  0x1f   : > { %p1579_p13 = por %p75_p10, %p48_p2  ;;  %p1585_p0 = por %p81_p11, %p1552_p7 }
  0x20   : > { %2014 = sst [smem:[#allocation19_spill]] %s1575_s8  ;;  %s94_s24 = sadd.s32 1, %s1393_s11 }
  0x21   : > { %p104_p1 = scmp.ne.s32.totalorder %s1393_s11, %s1389_s10  ;;  %p105_p4 = scmp.eq.s32.totalorder %s990_s23, 3 }
  0x22   : > { %s1593_s28 = scalar_select %p92_p12, %s1393_s11, %s94_s24  }
  0x23   : > { %p110_p5 = scmp.ne.s32.totalorder %s1389_s10, %s1385_s9  ;;  %s2018_s12 = sadd.s32 4294967294, %s1437_s22  }
  0x24   : > { %2017 = sst [smem:[#allocation20_spill]] %s1593_s28  ;;  %p111_p6 = scmp.eq.s32.totalorder %s2018_s12, 3 }
  0x25   : > { %p1601_p9 = por %p105_p4, %p104_p1  ;;  %p993_p7 = scmp.ge.s32.totalorder %s1437_s22, 4 }
  0x26   : > { %p1605_p2 = por %p111_p6, %p110_p5  ;;  %s131_s24 = sand.u32 (!%p993_p7), 1, %s1417_s17  }
  0x27   : > { %127 = sbr.rel (%p993_p7) target bundleno = 72 (0x48), region = 16  ;;  %s995_s30 = sshll.u32 (!%p993_p7), %s1429_s20, 2 }
  0x28   : > { %s2020_s6 = scalar_select %p1605_p2, 1, 0 }
  0x29   : > { %s994_s23 = sshll.u32 (!%p993_p7), %s131_s24, 2  ;;  %s2022_s0 = sld [smem:[#allocation22_spill]] (!%p993_p7) }
  0x2a   : > { %2021 = sst [smem:[#allocation21_spill]] %s2020_s6  ;;  %s135_s3 = scalar_lea.vmem (!%p993_p7), [#allocation4], %s994_s23 }
  0x2b   : > { %s143_s8 = sshll.u32 (!%p993_p7), %s135_s3, 4  ;;  %s132_s28 = scalar_lea.sflag (!%p993_p7), [#allocation5], %s131_s24  ;;  %s144_s8 = int_to_ptr.vmem [resolvable:$true] %s143_s8 }
  0x2c   : > { %s150_s17 = sand.u32 (%p1579_p13), 1, %s1405_s14   ;;  %s997_s11 = sshll.u32 (%p1579_p13), %s1429_s20, 6 }
  0x2d   : > { %149 = sbr.rel (!%p1579_p13) target bundleno = 72 (0x48), region = 24  ;;  %s996_s6 = sshll.u32 (%p1579_p13), %s150_s17, 9 }
  0x2e   : > { %s156_s9 = ssub.s32 (%p1579_p13), 125, %s997_s11  ;;  %s1624_s23 = scalar_lea.sflag (%p1579_p13), [#allocation8], %s150_s17 }
  0x2f   : > { %s139_s12 = scalar_lea.hbm %s2022_s0, %s995_s30  ;;  %p157_p10 = scmp.lt.s32.totalorder (%p1579_p13), %s156_s9, 64 }
  0x30   : > { %s141_s25 = sshll.u32 %s139_s12, 4  ;;  %s142_s25 = int_to_ptr.hbm [resolvable:$true] %s141_s25 }
  0x31   : > { %1088 = dma.hbm_to_vmem [thread:$0]  (%p1545_p3), %s142_s25, 64, %s144_s8, %s132_s28  }
  0x32   : > { %s2064_s9 = smov (!%p157_p10, %s156_s9), 64  ;;  %s154_s25 = scalar_lea.vmem [#allocation7], %s996_s6 }
  0x33   : > { %s998_s26 = sshll.u32 %s2064_s9, 3 }
  0x34   : > { %s160_s3 = ssub.s32 512, %s998_s26 }
  0x35   : > { %s161_s30 = sshll.u32 %s160_s3, 4 }
  0x36   : > { %162 = vsyncadd %s1624_s23, %s161_s30  ;;  %p1627_p3 = scmp.ne.s32.totalorder %s998_s26, 0  ;;  %s1087_s11 = sshll.u32 %s1429_s20, 7 }
  0x37   : > { %s165_s8 = sadd.s32 %s1433_s21, %s1087_s11  ;;  %s171_s15 = sshll.u32 %s154_s25, 4  ;;  %s172_s15 = int_to_ptr.vmem [resolvable:$true] %s171_s15 }
  0x38   : > { %s1001_s28 = sshll.u32 %s165_s8, 3  ;;  %s1003_s12 = sshll.u32 %s2064_s9, 7 }
  0x39   : > { %s167_s17 = scalar_lea.hbm %s1996_s1, %s1001_s28  ;;  %s1250_s3 = sshrl.u32 %s1003_s12, 4 }
  0x3a   : > { %s169_s6 = sshll.u32 %s167_s17, 4  ;;  %s1267_s30 = sshra.s32 %s172_s15, 4  ;;  %s170_s6 = int_to_ptr.hbm [resolvable:$true] %s169_s6  ;;  %s1268_s30 = int_to_ptr.vmem [resolvable:$true] %s1267_s30 }
  0x3b   : > { %s1274_s26 = scalar_lea.vmem %s1268_s30, %s1250_s3  ;;  %s1439_s0 = smov [#allocation7]  }
  0x3c   : > { %p1275_p11 = scmp.ne.s32.totalorder %s1268_s30, %s1274_s26  ;;  %s1278_s11 = scalar_lea.vmem %s1439_s0, 1024 }
  0x3d   : > { %p1280_p1 = scmp.lt.s32.totalorder %s1278_s11, %s1274_s26 }
  0x3e   : > { %p1276_p12 = pnand %p1275_p11, %p1627_p3 }
  0x40   : > { %p1277_p13 = pneg %p1276_p12 }
  0x42   : > { %p1282_p4 = pnand %p1280_p1, %p1277_p13 }
  0x44   : > { %1285 = shalt.err (!%p1282_p4)
}
  0x45   : > { %s1440_s25 = smov 256   ;;  %s1441_s8 = smov 128  }
  0x46   : > { %s1442_s9 = smov 8  }
  0x47   : > { %177 = dma.hbm_to_vmem [thread:$0]  (%p1627_p3), %s170_s6, %s1003_s12, %s172_s15, %s1624_s23, %s1440_s25, %s1441_s8, %s1442_s9  }
  0x48 PF: > { %p1004_p5 = scmp.ge.s32.totalorder %s1437_s22, 1  ;;  %p179_p6 = scmp.lt.s32.totalorder %s1437_s22, 5 }
  0x4a   : > { %p180_p7 = pnand %p1004_p5, %p179_p6 }
  0x4b   : > { %s185_s0 = sand.u32 (!%p180_p7), 1, %s1413_s16  }
  0x4c   : > { %183 = sbr.rel (%p180_p7) target bundleno = 456 (0x1c8), region = 28  ;;  %s1645_s28 = sshll.u32 (!%p180_p7), %s185_s0, 2 }
  0x4d   : > { %s186_s24 = scalar_lea.sflag (!%p180_p7), [#allocation5], %s185_s0  ;;  %s189_s7 = scalar_lea.vmem (!%p180_p7), [#allocation4], %s1645_s28 }
  0x51   : > { %1372 = dma.done.wait (%p1563_p8), %s186_s24, 64  }
  0x52   : > { %1374 = vsyncadd (%p1563_p8), %s186_s24, 4294967232  ;;  %s195_s23 = sand.u32 1, %s1401_s13  }
  0x53   : > { %s1006_s29 = sshll.u32 %s195_s23, 9  ;;  %s196_s15 = scalar_lea.sflag [#allocation8], %s195_s23 }
  0x54   : > { %s1653_s17 = scalar_lea.vmem [#allocation7], %s1006_s29 }
  0x55   : > { %1376 = dma.done.wait (%p1585_p0), %s196_s15, 8192  }
  0x56   : > { %1378 = vsyncadd (%p1585_p0), %s196_s15, 4294959104  ;;  %s223_s12 = sand.u32 1, %s1389_s10   ;;  %p1008_p8 = scmp.ne.s32.totalorder %s1421_s18, 0 }
  0x57   : > { %s1662_s6 = sshll.u32 %s223_s12, 1 }
  0x58   : > { %s225_s4 = scalar_lea.vmem [#allocation9], %s1662_s6  ;;  %235 = sbr.rel (%p1008_p8) target bundleno = 96 (0x60), region = 40 }
  0x5d   : > { %vm237_vm0 = vcmask 1024   ;;  %v1443_v0 = vmov 0.0  }
  0x5e   : > { %236 = vst [vmem:[#allocation2] sm:$0x3] %v1443_v0 }
  0x5f   : > { %238 = vst.msk [vmem:[#allocation3] sm:$0x3] %vm237_vm0, %v1443_v0 }
  0x60 PF: > { %v304_v1 = vlaneseq  ;;  %s1009_s27 = sshll.u32 %s1421_s18, 9  ;;  %v286_v12 = vld [vmem:[%s1653_s17 + $0x178] sm:$0xff]  ;;  %v285_v24 = vld [vmem:[%s1653_s17 + $0x170] sm:$0xff]  ;;  %v284_v27 = vld [vmem:[%s1653_s17 + $0x168] sm:$0xff]  ;;  %p1082_p0 = scmp.ne.s32.totalorder %s1421_s18, 1 }
  0x61   : > { %v1670_v3 = vstv %s1009_s27  ;;  %v302_v15 = vld [vmem:[%s1653_s17 + $0x1f8] sm:$0xff]  ;;  %v301_v25 = vld [vmem:[%s1653_s17 + $0x1f0] sm:$0xff]  ;;  %v283_v38 = vld [vmem:[%s1653_s17 + $0x160] sm:$0xff] }
  0x62   : > { %v1668_v2 = vshrl.u32 %v304_v1, 7  ;;  %v254_v18 = vld [vmem:[%s1653_s17 + $0x78] sm:$0xff]  ;;  %v253_v26 = vld [vmem:[%s1653_s17 + $0x70] sm:$0xff]  ;;  %v300_v42 = vld [vmem:[%s1653_s17 + $0x1e8] sm:$0xff] }
  0x63   : > { %v270_v19 = vld [vmem:[%s1653_s17 + $0xf8] sm:$0xff]  ;;  %v269_v36 = vld [vmem:[%s1653_s17 + $0xf0] sm:$0xff]  ;;  %v252_v43 = vld [vmem:[%s1653_s17 + $0x68] sm:$0xff] }
  0x64   : > { %v387_v4 = vadd.s32 376, %v1668_v2  ;;  %v386_v5 = vadd.s32 368, %v1668_v2  ;;  %v403_v6 = vadd.s32 504, %v1668_v2  ;;  %v355_v7 = vadd.s32 120, %v1668_v2  ;;  %v268_v48 = vld [vmem:[%s1653_s17 + $0xe8] sm:$0xff]  ;;  %v282_v49 = vld [vmem:[%s1653_s17 + $0x158] sm:$0xff] }
  0x65   : > { %v371_v8 = vadd.s32 248, %v1668_v2  ;;  %v385_v9 = vadd.s32 360, %v1668_v2  ;;  %v402_v10 = vadd.s32 496, %v1668_v2  ;;  %v354_v11 = vadd.s32 112, %v1668_v2  ;;  %v299_v50 = vld [vmem:[%s1653_s17 + $0x1e0] sm:$0xff]  ;;  %v281_v62 = vld [vmem:[%s1653_s17 + $0x150] sm:$0xff] }
  0x66   : > { %v451_v13 = vadd.s32 %v387_v4, %v1670_v3  ;;  %v450_v14 = vadd.s32 %v386_v5, %v1670_v3  ;;  %v467_v16 = vadd.s32 %v403_v6, %v1670_v3  ;;  %v419_v17 = vadd.s32 %v355_v7, %v1670_v3  ;;  %v251_v51 = vld [vmem:[%s1653_s17 + $0x60] sm:$0xff]  ;;  %v298_v5 = vld [vmem:[%s1653_s17 + $0x1d8] sm:$0xff] }
  0x67   : > { %v435_v20 = vadd.s32 %v371_v8, %v1670_v3  ;;  %v449_v21 = vadd.s32 %v385_v9, %v1670_v3  ;;  %v466_v22 = vadd.s32 %v402_v10, %v1670_v3  ;;  %v418_v23 = vadd.s32 %v354_v11, %v1670_v3  ;;  %v267_v60 = vld [vmem:[%s1653_s17 + $0xe0] sm:$0xff]  ;;  %v250_v6 = vld [vmem:[%s1653_s17 + $0x58] sm:$0xff] }
  0x68   : > { %vm515_vm1 = vcmp.lt.s32.totalorder %v451_v13, 1000  ;;  %vm514_vm2 = vcmp.lt.s32.totalorder %v450_v14, 1000  ;;  %vm531_vm3 = vcmp.lt.s32.totalorder %v467_v16, 1000  ;;  %vm483_vm4 = vcmp.lt.s32.totalorder %v419_v17, 1000  ;;  %v266_v11 = vld [vmem:[%s1653_s17 + $0xd8] sm:$0xff]  ;;  %v297_v14 = vld [vmem:[%s1653_s17 + $0x1d0] sm:$0xff] }
  0x69   : > { %1048 = vmatpush.msk.msra.mxu2 %vm515_vm1, %v286_v12  ;;  %1065 = vmatpush.msk.msra.mxu3 %vm531_vm3, %v302_v15  ;;  %vm499_vm5 = vcmp.lt.s32.totalorder %v435_v20, 1000  ;;  %vm513_vm6 = vcmp.lt.s32.totalorder %v449_v21, 1000  ;;  %vm530_vm7 = vcmp.lt.s32.totalorder %v466_v22, 1000  ;;  %vm482_vm8 = vcmp.lt.s32.totalorder %v418_v23, 1000  ;;  %v280_v12 = vld [vmem:[%s1653_s17 + $0x148] sm:$0xff]  ;;  %v249_v15 = vld [vmem:[%s1653_s17 + $0x50] sm:$0xff] }
  0x6a   : > { %1014 = vmatpush.msk.msra.mxu0 %vm483_vm4, %v254_v18  ;;  %1031 = vmatpush.msk.msra.mxu1 %vm499_vm5, %v270_v19  ;;  %v370_v28 = vadd.s32 240, %v1668_v2  ;;  %v384_v29 = vadd.s32 352, %v1668_v2  ;;  %v401_v30 = vadd.s32 488, %v1668_v2  ;;  %v353_v31 = vadd.s32 104, %v1668_v2  ;;  %v265_v16 = vld [vmem:[%s1653_s17 + $0xd0] sm:$0xff] }
  0x6b   : > { %1049 = vmatpush.msk.msra.mxu2 %vm514_vm2, %v285_v24  ;;  %1066 = vmatpush.msk.msra.mxu3 %vm530_vm7, %v301_v25  ;;  %v369_v32 = vadd.s32 232, %v1668_v2  ;;  %v383_v33 = vadd.s32 344, %v1668_v2  ;;  %v400_v34 = vadd.s32 480, %v1668_v2  ;;  %v352_v35 = vadd.s32 96, %v1668_v2  ;;  %v279_v24 = vld [vmem:[%s1653_s17 + $0x140] sm:$0xff] }
  0x6c   : > { %1015 = vmatpush.msk.msra.mxu0 %vm482_vm8, %v253_v26  ;;  %v434_v37 = vadd.s32 %v370_v28, %v1670_v3  ;;  %v448_v39 = vadd.s32 %v384_v29, %v1670_v3  ;;  %v465_v40 = vadd.s32 %v401_v30, %v1670_v3  ;;  %v417_v41 = vadd.s32 %v353_v31, %v1670_v3  ;;  %v296_v26 = vld [vmem:[%s1653_s17 + $0x1c8] sm:$0xff] }
  0x6d   : > { %1050 = vmatpush.msk.msra.mxu2 %vm513_vm6, %v284_v27  ;;  %v433_v44 = vadd.s32 %v369_v32, %v1670_v3  ;;  %v447_v45 = vadd.s32 %v383_v33, %v1670_v3  ;;  %v464_v46 = vadd.s32 %v400_v34, %v1670_v3  ;;  %v416_v47 = vadd.s32 %v352_v35, %v1670_v3  ;;  %v248_v29 = vld [vmem:[%s1653_s17 + $0x48] sm:$0xff]  ;;  %v278_v35 = vld [vmem:[%s1653_s17 + $0x138] sm:$0xff] }
  0x6e   : > { %vm498_vm9 = vcmp.lt.s32.totalorder %v434_v37, 1000  ;;  %vm512_vm10 = vcmp.lt.s32.totalorder %v448_v39, 1000  ;;  %vm529_vm11 = vcmp.lt.s32.totalorder %v465_v40, 1000  ;;  %vm481_vm12 = vcmp.lt.s32.totalorder %v417_v41, 1000  ;;  %v264_v31 = vld [vmem:[%s1653_s17 + $0xc8] sm:$0xff]  ;;  %v247_v39 = vld [vmem:[%s1653_s17 + $0x40] sm:$0xff] }
  0x6f   : > { %1032 = vmatpush.msk.msra.mxu1 %vm498_vm9, %v269_v36  ;;  %1051 = vmatpush.msk.msra.mxu2 %vm512_vm10, %v283_v38  ;;  %vm497_vm13 = vcmp.lt.s32.totalorder %v433_v44, 1000  ;;  %vm511_vm14 = vcmp.lt.s32.totalorder %v447_v45, 1000  ;;  %vm528_vm15 = vcmp.lt.s32.totalorder %v464_v46, 1000  ;;  %vm480_vm0 = vcmp.lt.s32.totalorder %v416_v47, 1000  ;;  %v295_v36 = vld [vmem:[%s1653_s17 + $0x1c0] sm:$0xff] }
  0x70   : > { %1067 = vmatpush.msk.msra.mxu3 %vm529_vm11, %v300_v42  ;;  %1016 = vmatpush.msk.msra.mxu0 %vm481_vm12, %v252_v43  ;;  %v368_v52 = vadd.s32 224, %v1668_v2  ;;  %v382_v53 = vadd.s32 336, %v1668_v2  ;;  %v399_v54 = vadd.s32 472, %v1668_v2  ;;  %v351_v55 = vadd.s32 88, %v1668_v2  ;;  %v263_v40 = vld [vmem:[%s1653_s17 + $0xc0] sm:$0xff] }
  0x71   : > { %1033 = vmatpush.msk.msra.mxu1 %vm497_vm13, %v268_v48  ;;  %1052 = vmatpush.msk.msra.mxu2 %vm511_vm14, %v282_v49  ;;  %v367_v56 = vadd.s32 216, %v1668_v2  ;;  %v381_v57 = vadd.s32 328, %v1668_v2  ;;  %v398_v58 = vadd.s32 464, %v1668_v2  ;;  %v350_v59 = vadd.s32 80, %v1668_v2  ;;  %v277_v48 = vld [vmem:[%s1653_s17 + $0x130] sm:$0xff] }
  0x72   : > { %1068 = vmatpush.msk.msra.mxu3 %vm528_vm15, %v299_v50  ;;  %1017 = vmatpush.msk.msra.mxu0 %vm480_vm0, %v251_v51  ;;  %v432_v61 = vadd.s32 %v368_v52, %v1670_v3  ;;  %v446_v63 = vadd.s32 %v382_v53, %v1670_v3  ;;  %v463_v0 = vadd.s32 %v399_v54, %v1670_v3  ;;  %v366_v4 = vadd.s32 208, %v1668_v2  ;;  %v294_v50 = vld [vmem:[%s1653_s17 + $0x1b8] sm:$0xff] }
  0x73   : > { %v415_v7 = vadd.s32 %v351_v55, %v1670_v3  ;;  %v431_v8 = vadd.s32 %v367_v56, %v1670_v3  ;;  %v445_v9 = vadd.s32 %v381_v57, %v1670_v3  ;;  %v462_v10 = vadd.s32 %v398_v58, %v1670_v3  ;;  %v246_v53 = vld [vmem:[%s1653_s17 + $0x38] sm:$0xff] }
  0x74   : > { %vm496_vm1 = vcmp.lt.s32.totalorder %v432_v61, 1000  ;;  %vm510_vm2 = vcmp.lt.s32.totalorder %v446_v63, 1000  ;;  %vm527_vm3 = vcmp.lt.s32.totalorder %v463_v0, 1000  ;;  %v414_v13 = vadd.s32 %v350_v59, %v1670_v3  ;;  %v262_v55 = vld [vmem:[%s1653_s17 + $0xb8] sm:$0xff]  ;;  %v276_v59 = vld [vmem:[%s1653_s17 + $0x128] sm:$0xff]  ;;  %v245_v63 = vld [vmem:[%s1653_s17 + $0x30] sm:$0xff] }
  0x75   : > { %1034 = vmatpush.msk.msra.mxu1 %vm496_vm1, %v267_v60  ;;  %1053 = vmatpush.msk.msra.mxu2 %vm510_vm2, %v281_v62  ;;  %vm479_vm4 = vcmp.lt.s32.totalorder %v415_v7, 1000  ;;  %vm495_vm5 = vcmp.lt.s32.totalorder %v431_v8, 1000  ;;  %vm509_vm6 = vcmp.lt.s32.totalorder %v445_v9, 1000  ;;  %vm526_vm7 = vcmp.lt.s32.totalorder %v462_v10, 1000  ;;  %v293_v60 = vld [vmem:[%s1653_s17 + $0x1b0] sm:$0xff] }
  0x76   : > { %1069 = vmatpush.msk.msra.mxu3 %vm527_vm3, %v298_v5  ;;  %1018 = vmatpush.msk.msra.mxu0 %vm479_vm4, %v250_v6  ;;  %vm478_vm8 = vcmp.lt.s32.totalorder %v414_v13, 1000  ;;  %v430_v17 = vadd.s32 %v366_v4, %v1670_v3  ;;  %v380_v18 = vadd.s32 320, %v1668_v2  ;;  %v397_v19 = vadd.s32 456, %v1668_v2  ;;  %v261_v0 = vld [vmem:[%s1653_s17 + $0xb0] sm:$0xff]  ;;  %v292_v13 = vld [vmem:[%s1653_s17 + $0x1a8] sm:$0xff] }
  0x77   : > { %1035 = vmatpush.msk.msra.mxu1 %vm495_vm5, %v266_v11  ;;  %1054 = vmatpush.msk.msra.mxu2 %vm509_vm6, %v280_v12  ;;  %v349_v20 = vadd.s32 72, %v1668_v2  ;;  %v365_v21 = vadd.s32 200, %v1668_v2  ;;  %v379_v22 = vadd.s32 312, %v1668_v2  ;;  %v396_v23 = vadd.s32 448, %v1668_v2  ;;  %v275_v11 = vld [vmem:[%s1653_s17 + $0x120] sm:$0xff] }
  0x78   : > { %1070 = vmatpush.msk.msra.mxu3 %vm526_vm7, %v297_v14  ;;  %1019 = vmatpush.msk.msra.mxu0 %vm478_vm8, %v249_v15  ;;  %vm494_vm9 = vcmp.lt.s32.totalorder %v430_v17, 1000  ;;  %v444_v25 = vadd.s32 %v380_v18, %v1670_v3  ;;  %v461_v27 = vadd.s32 %v397_v19, %v1670_v3  ;;  %v348_v28 = vadd.s32 64, %v1668_v2  ;;  %v260_v18 = vld [vmem:[%s1653_s17 + $0xa8] sm:$0xff] }
  0x79   : > { %1036 = vmatpush.msk.msra.mxu1 %vm494_vm9, %v265_v16  ;;  %v413_v30 = vadd.s32 %v349_v20, %v1670_v3  ;;  %v429_v32 = vadd.s32 %v365_v21, %v1670_v3  ;;  %v443_v33 = vadd.s32 %v379_v22, %v1670_v3  ;;  %v460_v34 = vadd.s32 %v396_v23, %v1670_v3  ;;  %v244_v16 = vld [vmem:[%s1653_s17 + $0x28] sm:$0xff]  ;;  %v274_v22 = vld [vmem:[%s1653_s17 + $0x118] sm:$0xff]  ;;  %v291_v23 = vld [vmem:[%s1653_s17 + $0x1a0] sm:$0xff] }
  0x7a   : > { %vm508_vm10 = vcmp.lt.s32.totalorder %v444_v25, 1000  ;;  %vm525_vm11 = vcmp.lt.s32.totalorder %v461_v27, 1000  ;;  %v412_v37 = vadd.s32 %v348_v28, %v1670_v3  ;;  %v364_v38 = vadd.s32 192, %v1668_v2  ;;  %v259_v27 = vld [vmem:[%s1653_s17 + $0xa0] sm:$0xff] }
  0x7b   : > { %1055 = vmatpush.msk.msra.mxu2 %vm508_vm10, %v279_v24  ;;  %1071 = vmatpush.msk.msra.mxu3 %vm525_vm11, %v296_v26  ;;  %vm477_vm12 = vcmp.lt.s32.totalorder %v413_v30, 1000  ;;  %vm493_vm13 = vcmp.lt.s32.totalorder %v429_v32, 1000  ;;  %vm507_vm14 = vcmp.lt.s32.totalorder %v443_v33, 1000  ;;  %vm524_vm15 = vcmp.lt.s32.totalorder %v460_v34, 1000  ;;  %v243_v26 = vld [vmem:[%s1653_s17 + $0x20] sm:$0xff] }
  0x7c   : > { %1020 = vmatpush.msk.msra.mxu0 %vm477_vm12, %v248_v29  ;;  %1037 = vmatpush.msk.msra.mxu1 %vm493_vm13, %v264_v31  ;;  %vm476_vm0 = vcmp.lt.s32.totalorder %v412_v37, 1000  ;;  %v428_v41 = vadd.s32 %v364_v38, %v1670_v3  ;;  %v378_v42 = vadd.s32 304, %v1668_v2  ;;  %v395_v43 = vadd.s32 440, %v1668_v2  ;;  %v290_v37 = vld [vmem:[%s1653_s17 + $0x198] sm:$0xff] }
  0x7d   : > { %1056 = vmatpush.msk.msra.mxu2 %vm507_vm14, %v278_v35  ;;  %1072 = vmatpush.msk.msra.mxu3 %vm524_vm15, %v295_v36  ;;  %v347_v44 = vadd.s32 56, %v1668_v2  ;;  %v363_v45 = vadd.s32 184, %v1668_v2  ;;  %v377_v46 = vadd.s32 296, %v1668_v2  ;;  %v394_v47 = vadd.s32 432, %v1668_v2  ;;  %v273_v35 = vld [vmem:[%s1653_s17 + $0x110] sm:$0xff] }
  0x7e   : > { %1021 = vmatpush.msk.msra.mxu0 %vm476_vm0, %v247_v39  ;;  %vm492_vm1 = vcmp.lt.s32.totalorder %v428_v41, 1000  ;;  %v442_v49 = vadd.s32 %v378_v42, %v1670_v3  ;;  %v459_v51 = vadd.s32 %v395_v43, %v1670_v3  ;;  %v346_v52 = vadd.s32 48, %v1668_v2  ;;  %v258_v42 = vld [vmem:[%s1653_s17 + $0x98] sm:$0xff] }
  0x7f   : > { %1038 = vmatpush.msk.msra.mxu1 %vm492_vm1, %v263_v40  ;;  %v411_v54 = vadd.s32 %v347_v44, %v1670_v3  ;;  %v427_v56 = vadd.s32 %v363_v45, %v1670_v3  ;;  %v441_v57 = vadd.s32 %v377_v46, %v1670_v3  ;;  %v458_v58 = vadd.s32 %v394_v47, %v1670_v3  ;;  %v242_v40 = vld [vmem:[%s1653_s17 + $0x18] sm:$0xff]  ;;  %v272_v44 = vld [vmem:[%s1653_s17 + $0x108] sm:$0xff]  ;;  %v289_v47 = vld [vmem:[%s1653_s17 + $0x190] sm:$0xff] }
  0x80   : > { %vm506_vm2 = vcmp.lt.s32.totalorder %v442_v49, 1000  ;;  %vm523_vm3 = vcmp.lt.s32.totalorder %v459_v51, 1000  ;;  %v410_v61 = vadd.s32 %v346_v52, %v1670_v3  ;;  %v362_v62 = vadd.s32 176, %v1668_v2  ;;  %v241_v51 = vld [vmem:[%s1653_s17 + $0x10] sm:$0xff] }
  0x81   : > { %1057 = vmatpush.msk.msra.mxu2 %vm506_vm2, %v277_v48  ;;  %1073 = vmatpush.msk.msra.mxu3 %vm523_vm3, %v294_v50  ;;  %vm475_vm4 = vcmp.lt.s32.totalorder %v411_v54, 1000  ;;  %vm491_vm5 = vcmp.lt.s32.totalorder %v427_v56, 1000  ;;  %vm505_vm6 = vcmp.lt.s32.totalorder %v441_v57, 1000  ;;  %vm522_vm7 = vcmp.lt.s32.totalorder %v458_v58, 1000  ;;  %v303_v50 = vld [vmem:[%s189_s7] sm:$0xf] }
  0x82   : > { %1022 = vmatpush.msk.msra.mxu0 %vm475_vm4, %v246_v53  ;;  %1039 = vmatpush.msk.msra.mxu1 %vm491_vm5, %v262_v55  ;;  %vm474_vm8 = vcmp.lt.s32.totalorder %v410_v61, 1000  ;;  %v426_v4 = vadd.s32 %v362_v62, %v1670_v3  ;;  %v376_v5 = vadd.s32 288, %v1668_v2  ;;  %v393_v6 = vadd.s32 424, %v1668_v2  ;;  %v257_v52 = vld [vmem:[%s1653_s17 + $0x90] sm:$0xff]  ;;  %v288_v62 = vld [vmem:[%s1653_s17 + $0x188] sm:$0xff] }
  0x83   : > { %1058 = vmatpush.msk.msra.mxu2 %vm505_vm6, %v276_v59  ;;  %1074 = vmatpush.msk.msra.mxu3 %vm522_vm7, %v293_v60  ;;  %v345_v7 = vadd.s32 40, %v1668_v2  ;;  %v361_v8 = vadd.s32 168, %v1668_v2  ;;  %v375_v9 = vadd.s32 280, %v1668_v2  ;;  %v392_v10 = vadd.s32 416, %v1668_v2  ;;  %v271_v60 = vld [vmem:[%s1653_s17 + $0x100] sm:$0xff] }
  0x84   : > { %1023 = vmatpush.msk.msra.mxu0 %vm474_vm8, %v245_v63  ;;  %vm490_vm9 = vcmp.lt.s32.totalorder %v426_v4, 1000  ;;  %v440_v12 = vadd.s32 %v376_v5, %v1670_v3  ;;  %v457_v14 = vadd.s32 %v393_v6, %v1670_v3  ;;  %v344_v15 = vadd.s32 32, %v1668_v2 }
  0x85   : > { %1040 = vmatpush.msk.msra.mxu1 %vm490_vm9, %v261_v0  ;;  %v409_v17 = vadd.s32 %v345_v7, %v1670_v3  ;;  %v425_v19 = vadd.s32 %v361_v8, %v1670_v3  ;;  %v439_v20 = vadd.s32 %v375_v9, %v1670_v3  ;;  %v456_v21 = vadd.s32 %v392_v10, %v1670_v3 }
  0x86   : > { %vm504_vm10 = vcmp.lt.s32.totalorder %v440_v12, 1000  ;;  %vm521_vm11 = vcmp.lt.s32.totalorder %v457_v14, 1000  ;;  %v408_v24 = vadd.s32 %v344_v15, %v1670_v3  ;;  %v360_v25 = vadd.s32 160, %v1668_v2 }
  0x87   : > { %1059 = vmatpush.msk.msra.mxu2 %vm504_vm10, %v275_v11  ;;  %1075 = vmatpush.msk.msra.mxu3 %vm521_vm11, %v292_v13  ;;  %vm473_vm12 = vcmp.lt.s32.totalorder %v409_v17, 1000  ;;  %vm489_vm13 = vcmp.lt.s32.totalorder %v425_v19, 1000  ;;  %vm503_vm14 = vcmp.lt.s32.totalorder %v439_v20, 1000  ;;  %vm520_vm15 = vcmp.lt.s32.totalorder %v456_v21, 1000 }
  0x88   : > { %1024 = vmatpush.msk.msra.mxu0 %vm473_vm12, %v244_v16  ;;  %1041 = vmatpush.msk.msra.mxu1 %vm489_vm13, %v260_v18  ;;  %vm472_vm0 = vcmp.lt.s32.totalorder %v408_v24, 1000  ;;  %v424_v28 = vadd.s32 %v360_v25, %v1670_v3  ;;  %v374_v29 = vadd.s32 272, %v1668_v2  ;;  %v391_v30 = vadd.s32 408, %v1668_v2  ;;  %v240_v18 = vld [vmem:[%s1653_s17 + $0x8] sm:$0xff] }
  0x89   : > { %1060 = vmatpush.msk.msra.mxu2 %vm503_vm14, %v274_v22  ;;  %1076 = vmatpush.msk.msra.mxu3 %vm520_vm15, %v291_v23  ;;  %v343_v31 = vadd.s32 24, %v1668_v2  ;;  %v359_v32 = vadd.s32 152, %v1668_v2  ;;  %v373_v33 = vadd.s32 264, %v1668_v2  ;;  %v390_v34 = vadd.s32 400, %v1668_v2  ;;  %v256_v24 = vld [vmem:[%s1653_s17 + $0x88] sm:$0xff] }
  0x8a   : > { %1025 = vmatpush.msk.msra.mxu0 %vm472_vm0, %v243_v26  ;;  %vm488_vm1 = vcmp.lt.s32.totalorder %v424_v28, 1000  ;;  %v438_v36 = vadd.s32 %v374_v29, %v1670_v3  ;;  %v455_v38 = vadd.s32 %v391_v30, %v1670_v3  ;;  %v342_v39 = vadd.s32 16, %v1668_v2  ;;  %v287_v26 = vld [vmem:[%s1653_s17 + $0x180] sm:$0xff] }
  0x8b   : > { %1042 = vmatpush.msk.msra.mxu1 %vm488_vm1, %v259_v27  ;;  %v407_v41 = vadd.s32 %v343_v31, %v1670_v3  ;;  %v423_v43 = vadd.s32 %v359_v32, %v1670_v3  ;;  %v437_v45 = vadd.s32 %v373_v33, %v1670_v3  ;;  %v454_v46 = vadd.s32 %v390_v34, %v1670_v3  ;;  %v239_v30 = vld [vmem:[%s1653_s17] sm:$0xff] }
  0x8c   : > { %vm502_vm2 = vcmp.lt.s32.totalorder %v438_v36, 1000  ;;  %vm519_vm3 = vcmp.lt.s32.totalorder %v455_v38, 1000  ;;  %v406_v48 = vadd.s32 %v342_v39, %v1670_v3  ;;  %v358_v49 = vadd.s32 144, %v1668_v2 }
  0x8d   : > { %1061 = vmatpush.msk.msra.mxu2 %vm502_vm2, %v273_v35  ;;  %1077 = vmatpush.msk.msra.mxu3 %vm519_vm3, %v290_v37  ;;  %vm471_vm4 = vcmp.lt.s32.totalorder %v407_v41, 1000  ;;  %vm487_vm5 = vcmp.lt.s32.totalorder %v423_v43, 1000  ;;  %vm501_vm6 = vcmp.lt.s32.totalorder %v437_v45, 1000  ;;  %vm518_vm7 = vcmp.lt.s32.totalorder %v454_v46, 1000 }
  0x8e   : > { %1026 = vmatpush.msk.msra.mxu0 %vm471_vm4, %v242_v40  ;;  %1043 = vmatpush.msk.msra.mxu1 %vm487_vm5, %v258_v42  ;;  %vm470_vm8 = vcmp.lt.s32.totalorder %v406_v48, 1000  ;;  %v422_v53 = vadd.s32 %v358_v49, %v1670_v3  ;;  %v372_v54 = vadd.s32 256, %v1668_v2  ;;  %v389_v55 = vadd.s32 392, %v1668_v2  ;;  %v255_v40 = vld [vmem:[%s1653_s17 + $0x80] sm:$0xff] }
  0x8f   : > { %1062 = vmatpush.msk.msra.mxu2 %vm501_vm6, %v272_v44  ;;  %1078 = vmatpush.msk.msra.mxu3 %vm518_vm7, %v289_v47  ;;  %v306_v56 = vperm.slane %v303_v50, 0  ;;  %v307_v57 = vperm.slane %v303_v50, 1  ;;  %v308_v58 = vperm.slane %v303_v50, 2  ;;  %v309_v59 = vperm.slane %v303_v50, 3 }
  0x90   : > { %1027 = vmatpush.msk.msra.mxu0 %vm470_vm8, %v241_v51  ;;  %vm486_vm9 = vcmp.lt.s32.totalorder %v422_v53, 1000  ;;  %v436_v61 = vadd.s32 %v372_v54, %v1670_v3  ;;  %v453_v63 = vadd.s32 %v389_v55, %v1670_v3  ;;  %v315_v0 = vand.u32 127, %v304_v1 }
  0x91   : > { %1044 = vmatpush.msk.msra.mxu1 %vm486_vm9, %v257_v52  ;;  %vm1855_vm10 = vcmp.eq.s32.totalorder %v306_v56, %v1668_v2  ;;  %vm1860_vm11 = vcmp.eq.s32.totalorder %v307_v57, %v1668_v2  ;;  %vm1865_vm12 = vcmp.eq.s32.totalorder %v308_v58, %v1668_v2  ;;  %vm1870_vm13 = vcmp.eq.s32.totalorder %v309_v59, %v1668_v2  ;;  %v732_v56 = vld [vmem:[#allocation2] sm:$0x3]  ;;  %v815_v59 = vld [vmem:[#allocation3] sm:$0x3] }
  0x92   : > { %vm500_vm14 = vcmp.lt.s32.totalorder %v436_v61, 1000  ;;  %vm517_vm15 = vcmp.lt.s32.totalorder %v453_v63, 1000  ;;  %v316_v1 = vadd.s32 128, %v315_v0  ;;  %v317_v8 = vadd.s32 256, %v315_v0 }
  0x93   : > { %1063 = vmatpush.msk.msra.mxu2 %vm500_vm14, %v271_v60  ;;  %1079 = vmatpush.msk.msra.mxu3 %vm517_vm15, %v288_v62  ;;  %v318_v9 = vadd.s32 384, %v315_v0  ;;  %v321_v10 = vadd.s32 %v1670_v3, %v315_v0  ;;  %vm816_vm0 = vcmask 1041408   ;;  %v341_v13 = vadd.s32 8, %v1668_v2 }
  0x94   : > { %v322_v11 = vadd.s32 %v1670_v3, %v316_v1  ;;  %v323_v12 = vadd.s32 %v1670_v3, %v317_v8  ;;  %v357_v15 = vadd.s32 136, %v1668_v2  ;;  %v388_v16 = vadd.s32 384, %v1668_v2 }
  0x95   : > { %v324_v14 = vadd.s32 %v1670_v3, %v318_v9  ;;  %vm325_vm1 = vcmp.lt.s32.totalorder %v321_v10, 1000  ;;  %v405_v19 = vadd.s32 %v341_v13, %v1670_v3  ;;  %v404_v20 = vadd.s32 %v1670_v3, %v1668_v2 }
  0x96   : > { %vm326_vm2 = vcmp.lt.s32.totalorder %v322_v11, 1000  ;;  %vm327_vm3 = vcmp.lt.s32.totalorder %v323_v12, 1000  ;;  %vm1883_vm4 = vmand %vm1855_vm10, %vm325_vm1  ;;  %v1444_v22 = vmov 0   ;;  %v421_v25 = vadd.s32 %v357_v15, %v1670_v3 }
  0x97   : > { %vm328_vm5 = vcmp.lt.s32.totalorder %v324_v14, 1000  ;;  %vm1893_vm6 = vmand %vm1860_vm11, %vm326_vm2  ;;  %v724_v23 = vsel %vm1883_vm4, 1, %v1444_v22  ;;  %v452_v27 = vadd.s32 %v388_v16, %v1670_v3  ;;  %vm469_vm8 = vcmp.lt.s32.totalorder %v405_v19, 1000 }
  0x98   : > { %vm339_vm7 = vmand %vm1865_vm12, %vm327_vm3  ;;  %v725_v28 = vsel %vm1893_vm6, 1, %v1444_v22  ;;  %v817_v29 = vsel %vm816_vm0, %v724_v23, 0  ;;  %vm468_vm9 = vcmp.lt.s32.totalorder %v404_v20, 1000  ;;  %v1445_v33 = vmov 1.0   ;;  %1028 = vmatpush.msk.msra.mxu0 %vm469_vm8, %v240_v18 }
  0x99   : > { %vm340_vm10 = vmand %vm1870_vm13, %vm328_vm5  ;;  %v726_v31 = vsel %vm339_vm7, 1, %v1444_v22  ;;  %v818_v32 = vsel %vm816_vm0, %v725_v28, 0  ;;  %1064 = vmatmul.msk.f32.vlgmr.msra.gmra.mxu2 %vm339_vm7, %v1445_v33  ;;  %vm485_vm11 = vcmp.lt.s32.totalorder %v421_v25, 1000  ;;  %vm516_vm12 = vcmp.lt.s32.totalorder %v452_v27, 1000 }
  0x9a   : > { %v727_v34 = vsel %vm340_vm10, 1, %v1444_v22  ;;  %v819_v35 = vsel %vm816_vm0, %v726_v31, 0  ;;  %v821_v36 = vadd.s32 %v818_v32, %v817_v29  ;;  %1045 = vmatpush.msk.msra.mxu1 %vm485_vm11, %v256_v24  ;;  %1080 = vmatpush.msk.msra.mxu3 %vm516_vm12, %v287_v26  ;;  %v356_v37 = vadd.s32 128, %v1668_v2 }
  0x9b   : > { %v820_v38 = vsel %vm816_vm0, %v727_v34, 0  ;;  %1081 = vmatmul.msk.f32.vlgmr.msra.gmra.mxu3 %vm340_vm10, %v1445_v33  ;;  %1029 = vmatpush.msk.msra.mxu0 %vm468_vm9, %v239_v30  ;;  %vm838_vm14 = vcmask 1024  }
  0x9c   : > { %v822_v39 = vadd.s32 %v820_v38, %v819_v35  ;;  %v420_v41 = vadd.s32 %v356_v37, %v1670_v3  ;;  %1030 = vmatmul.msk.f32.vlgmr.msra.gmra.mxu0 %vm1883_vm4, %v1445_v33 }
  0x9e   : > { %v823_v42 = vadd.s32 %v822_v39, %v821_v36  ;;  %vm484_vm13 = vcmp.lt.s32.totalorder %v420_v41, 1000 }
  0x9f   : > { %1046 = vmatpush.msk.msra.mxu1 %vm484_vm13, %v255_v40 }
  0xa0   : > { %v825_v43 = vshrl.u32 %v823_v42, 16  ;;  %1047 = vmatmul.msk.f32.vlgmr.msra.gmra.mxu1 %vm1893_vm6, %v1445_v33  ;;  %v824_v44 = vand.u32 65535, %v823_v42 }
  0xa2   : > { %v827_v2 = vcvt.s32.f32 %v825_v43  ;;  %v826_v45 = vcvt.s32.f32 %v824_v44 }
  0xa4   : > { %830 = vadd.xlane.f32.xlu0 %v827_v2 }
  0xac   : > { %828 = vadd.xlane.f32.xlu0 %v826_v45 }
 0x117   : > { %v831_v46 = vpop.xlane.xlu0 %830 }
 0x118   : > { %v833_v47 = vcvt.f32.s32 %v831_v46 }
 0x119   : > { %v750_v48 = vpop.f32.mrf.mxu0 }
 0x11a   : > { %v834_v50 = vshll.u32 %v833_v47, 16 }
 0x11c   : > { %v790_v3 = vpop.f32.mrf.mxu2 }
 0x11d   : > { %v770_v49 = vpop.f32.mrf.mxu1 }
 0x11e   : > { %v771_v51 = vadd.f32 %v770_v49, %v750_v48  ;;  %v810_v53 = vpop.f32.mrf.mxu3 }
 0x11f   : > { %v829_v52 = vpop.xlane.xlu0 %828 }
 0x120   : > { %v832_v54 = vcvt.f32.s32 %v829_v52  ;;  %v791_v55 = vadd.f32 %v790_v3, %v771_v51 }
 0x122   : > { %v835_v57 = vadd.s32 %v834_v50, %v832_v54  ;;  %v811_v58 = vadd.f32 %v810_v53, %v791_v55 }
 0x124   : > { %v836_v60 = vcvt.s32.f32 %v835_v57  ;;  %v813_v61 = vadd.f32 %v811_v58, %v732_v56  ;;  %843 = sbr.rel (%p1082_p0) target bundleno = 441 (0x1b9), region = 44 }
 0x126   : > { %v837_v62 = vadd.f32 %v836_v60, %v815_v59  ;;  %814 = vst [vmem:[#allocation2] sm:$0x3] %v813_v61 }
 0x128   : > { %839 = vst.msk [vmem:[#allocation3] sm:$0x3] %vm838_vm14, %v837_v62 }
 0x129   : > { %v1446_v0 = vmov 0  }
 0x12a   : > { %1217 = vset.pattern.permute.xlu0 %v1446_v0 }
 0x12d   : > { %v846_v12 = vld [vmem:[#allocation2] sm:$0x3] }
 0x12f   : > { %v844_v63 = vld [vmem:[#allocation3] sm:$0x3] }
 0x130   : > { %v845_v4 = vmax.f32 %v844_v63, 1.0 }
 0x132   : > { %849 = vperm.xlu0 %1217, %v845_v4  }
 0x1a4   : > { %v850_v5 = vpop.permute.xlu0 %849 }
 0x1a5   : > { %1218 = vrcp.f32 %v850_v5  ;;  %v863_v8 = vand.u32 2147483648, %v850_v5  ;;  %v861_v10 = vand.u32 2147483647, %v850_v5  ;;  %vm857_vm0 = vweird.f32 %v850_v5 }
 0x1a7   : > { %v864_v13 = vor.u32 1.1754944e-38, %v863_v8  ;;  %vm862_vm2 = vcmp.eq.f32.partialorder %v861_v10, 8.507059e+37 }
 0x1ab   : > { %v1219_v6 = vpop.eup %1218 }
 0x1ac   : > { %v853_v7 = vmul.f32 %v1219_v6, %v850_v5  ;;  %vm858_vm15 = vweird.f32 %v1219_v6 }
 0x1ad   : > { %vm859_vm1 = vmor %vm857_vm0, %vm858_vm15 }
 0x1ae   : > { %v854_v1 = vsub.f32 1.0, %v853_v7 }
 0x1b0   : > { %v855_v9 = vmul.f32 %v1219_v6, %v854_v1 }
 0x1b2   : > { %v856_v11 = vadd.f32 %v1219_v6, %v855_v9 }
 0x1b4   : > { %v860_v14 = vsel %vm859_vm1, %v1219_v6, %v856_v11 }
 0x1b5   : > { %v865_v15 = vsel %vm862_vm2, %v864_v13, %v860_v14 }
 0x1b6   : > { %v866_v16 = vmul.f32 %v865_v15, %v846_v12 }
 0x1b8   : > { %867 = vst [vmem:[%s225_s4] sm:$0x3] %v866_v16 }
 0x1b9 PF: > { %s1084_s18 = sshll.u32 %s1425_s19, 1  ;;  %s881_s11 = sshll.u32 %s225_s4, 4  ;;  %s882_s11 = int_to_ptr.vmem [resolvable:$true] %s881_s11 }
 0x1ba   : > { %s879_s26 = scalar_lea.hbm %s1997_s2, %s1084_s18  ;;  %s869_s8 = scalar_lea.sflag [#allocation6], %s223_s12 }
 0x1bb   : > { %s883_s25 = sshll.u32 %s879_s26, 4  ;;  %s1307_s24 = scalar_lea.hbm %s1997_s2, 4  ;;  %s884_s25 = int_to_ptr.hbm [resolvable:$true] %s883_s25 }
 0x1bc   : > { %s1301_s9 = sshra.s32 %s884_s25, 4  ;;  %s1302_s9 = int_to_ptr.hbm [resolvable:$true] %s1301_s9 }
 0x1bd   : > { %s1303_s0 = scalar_lea.hbm %s1302_s9, 2  ;;  %p1308_p12 = scmp.lt.s32.totalorder %s1302_s9, %s1997_s2 }
 0x1be   : > { %p1304_p10 = scmp.ne.s32.totalorder %s1302_s9, %s1303_s0  ;;  %p1309_p13 = scmp.lt.s32.totalorder %s1307_s24, %s1303_s0 }
 0x1c0   : > { %p1305_p3 = pnand %p1304_p10, %p1601_p9  ;;  %p1310_p1 = por %p1309_p13, %p1308_p12 }
 0x1c2   : > { %p1306_p11 = pneg %p1305_p3 }
 0x1c4   : > { %p1311_p4 = pnand %p1310_p1, %p1306_p11 }
 0x1c6   : > { %1314 = shalt.err (!%p1311_p4)
}
 0x1c7   : > { %1091 = dma.vmem_to_hbm [thread:$0]  (%p1601_p9), %s882_s11, 32, %s884_s25, %s869_s8  }
 0x1c8 PF: > { %s2036_s29 = sld [smem:[#allocation13_spill]]  ;;  %p1097_p5 = scmp.ge.s32.totalorder %s1437_s22, 2 }
 0x1ca   : > { %p1094_p6 = pnand %p1097_p5, %p1605_p2 }
 0x1cc   : > { %p1095_p7 = pneg %p1094_p6 }
 0x1ce   : > { %s895_s17 = sand.u32 1, %s2036_s29  }
 0x1cf   : > { %s896_s12 = scalar_lea.sflag [#allocation6], %s895_s17 }
 0x1d0   : > { %1380 = dma.done.wait (%p1095_p7), %s896_s12, 32  }
 0x1d1   : > { %1382 = vsyncadd (%p1095_p7), %s896_s12, 4294967264  ;;  %s21_s22 = sadd.s32 1, %s1437_s22   ;;  %s2039_s5 = sld [smem:[#allocation14_spill]] }
 0x1d2   : > { %p1948_p8 = scmp.ge.s32.totalorder %s21_s22, 6   ;;  %s2040_s11 = sld [smem:[#allocation20_spill]] }
 0x1d3   : > { %s2041_s4 = sld [smem:[#allocation19_spill]]  ;;  %s2046_s9 = smov %s1389_s10 }
 0x1d4   : > { %s2042_s27 = sld [smem:[#allocation15_spill]]  ;;  %s2048_s12 = smov %s1401_s13 }
 0x1d5   : > { %s2043_s17 = sld [smem:[#allocation18_spill]]  ;;  %s2049_s13 = smov %s1405_s14 }
 0x1d6   : > { %s2044_s3 = sld [smem:[#allocation16_spill]]  ;;  %s2051_s15 = smov %s1413_s16 }
 0x1d7   : > { %s2045_s30 = sld [smem:[#allocation17_spill]]  ;;  %s2047_s10 = smov %s2039_s5 }
 0x1d8   : > { %s2053_s18 = smov %s1429_s20  ;;  %s2054_s19 = smov %s1433_s21 }
 0x1d9   : > { %s2050_s14 = smov %s2041_s4  ;;  %20 = sbr.rel (!%p1948_p8) target bundleno = 14 (0xe), region = 94 }
 0x1da   : > { %s2052_s16 = smov %s2042_s27 }
 0x1dc   : > { %s2055_s20 = smov %s2044_s3 }
 0x1dd   : > { %s2056_s21 = smov %s2045_s30 }
 0x1de   :  { %902 = vsyncpa [#allocation5], 1 }
 0x1df   :  { %904 = vsyncpa [#allocation5 + $0x1], 1 }
 0x1e0   :  { %905 = vsyncpa [#allocation8], 1 }
 0x1e1   :  { %907 = vsyncpa [#allocation8 + $0x1], 1 }
 0x1e2   :  { %908 = vsyncpa [#allocation6], 1 }
 0x1e3   :  { %910 = vsyncpa [#allocation6 + $0x1], 1 }

</bundles_post_ra>
